<compile_context>
chip_gen: v7x
topology: tpu7x:2x2x1
jax: 0.10.0
libtpu: 0.0.40
codegen_flags: <defaults>
</compile_context>

<pallas_src>
import jax
import jax.numpy as jnp
from jax.experimental import pallas as pl
from jax.experimental.pallas import tpu as pltpu


def _clip_kernel(x_ref, o_ref):
    # Elementwise clamp to [-1, 1] on the VPU; stays in the input dtype.
    x = x_ref[...]
    o_ref[...] = jnp.minimum(jnp.maximum(x, -1.0), 1.0)


_LANE_CANDIDATES = (1024, 512, 256, 128)   # lane-dense widths (multiples of 128)
_TARGET_BLOCK_BYTES = 2 * 1024 * 1024      # ~2 MiB/block → 2 in + 2 out buffers = 8 MiB


def _sublane_pack(dtype) -> int:
    # Sub-32-bit dtypes pack along sublanes: 8 rows/vreg for 32-bit,
    # 16 for 16-bit, 32 for 8-bit.
    return {4: 8, 2: 16, 1: 32}[jnp.dtype(dtype).itemsize]


@jax.jit
def pallas_clip(x: jax.Array) -> jax.Array:
    """Clamp x (any shape, e.g. NCHW) to [-1, 1] with a Pallas TPU kernel."""
    orig_shape = x.shape
    dtype = x.dtype
    itemsize = jnp.dtype(dtype).itemsize
    pack = _sublane_pack(dtype)

    total = x.size
    x_flat = x.reshape(-1)

    # Pick the widest lane width that divides the element count so the 2-D
    # reshape is a free bitcast (no padded copy of the full tensor in HBM).
    lane = None
    for cand in _LANE_CANDIDATES:
        if total % cand == 0:
            lane = cand
            break

    pad = 0
    if lane is None:
        # Rare fallback: element count not a multiple of 128.  Pad only the
        # flat tail up to one lane width (this path does copy, but only for
        # non-128-aligned sizes, which diffusion feature maps never hit).
        lane = 128
        pad = (-total) % lane
        x_flat = jnp.pad(x_flat, (0, pad))

    rows = (total + pad) // lane
    x2d = x_flat.reshape(rows, lane)

    # Biggest-tile-that-fits rule: ~2 MiB per block, rounded down to the
    # sublane packing so (block_rows, lane) satisfies the tiling constraint.
    block_rows = _TARGET_BLOCK_BYTES // (lane * itemsize)
    block_rows = max(pack, (block_rows // pack) * pack)
    if rows < block_rows:
        # Small input: one block covering the whole array (block dim == array
        # dim is always legal), no row padding needed.
        block_rows = rows

    grid = (pl.cdiv(rows, block_rows),)  # partial last block handled by Pallas

    # NOTE: input_output_aliases={0: 0} (donating x) is possible since clip can
    # be written in place, but is left off so callers can keep using x.
    out2d = pl.pallas_call(
        _clip_kernel,
        out_shape=jax.ShapeDtypeStruct((rows, lane), dtype),
        grid=grid,
        in_specs=[pl.BlockSpec((block_rows, lane), lambda i: (i, 0))],
        out_specs=pl.BlockSpec((block_rows, lane), lambda i: (i, 0)),
        compiler_params=pltpu.CompilerParams(
            dimension_semantics=("parallel",),     # lets v7x shard across 2 TCs
            vmem_limit_bytes=32 * 1024 * 1024,     # explicit; safe on v5e/v6e/v7x
        ),
    )(x2d)

    out_flat = out2d.reshape(-1)
    if pad:
        out_flat = out_flat[:total]
    return out_flat.reshape(orig_shape)


class Clipper:
    """Guidance Free DDPM Helper (JAX/Pallas port).

    Matches the PyTorch reference: __init__ stores `dim`; forward() takes no
    arguments and returns None (reference body is `pass`).
    """

    def __init__(self, dim: int):
        self.dim = dim

    def forward(self):
        # TODO(synk): reference forward() is a no-op (body is `pass`); there is
        # no tensor compute to translate, so it returns None exactly as PyTorch.
        return None

    # Extra utility (not part of the reference forward): the Pallas clip op.
    def clip(self, x: jax.Array) -> jax.Array:
        return pallas_clip(x)


if __name__ == "__main__":
    key = jax.random.PRNGKey(0)
    # Small NCHW input consistent with a diffusion feature map.
    x = jax.random.normal(key, (2, 4, 16, 16), dtype=jnp.float32) * 2.0

    module = Clipper(dim=4)

    # Exact reference semantics: forward() returns None.
    assert module.forward() is None

    # Run the Pallas kernel hot path once and block on it.
    y = module.clip(x)
    y = jax.block_until_ready(y)

    # Sanity check against plain-JAX clamp.
    ref = jnp.clip(x, -1.0, 1.0)
    assert y.shape == x.shape and y.dtype == x.dtype
    assert bool(jnp.allclose(y, ref))

    # Also exercise a bf16 input (sub-32-bit sublane packing path).
    xb = x.astype(jnp.bfloat16)
    yb = jax.block_until_ready(module.clip(xb))
    assert yb.dtype == jnp.bfloat16 and bool(
        jnp.allclose(yb.astype(jnp.float32), jnp.clip(xb, -1, 1).astype(jnp.float32))
    )

    print("KERNEL_OK")
</pallas_src>

<mosaic_0001>
module attributes {stable_mosaic.version = 11 : i64} {
  func.func @_clip_kernel(%arg0: i32, %arg1: memref<2x1024xf32, #tpu.memory_space<vmem>>, %arg2: memref<2x1024xf32, #tpu.memory_space<vmem>>) attributes {dimension_semantics = [#tpu.dimension_semantics<parallel>], iteration_bounds = array<i64: 1>, scalar_prefetch = 0 : i64, scratch_operands = 0 : i64, tpu.core_type = #tpu.core_type<tc>, window_params = [{transform_indices = @transform_0, window_bounds = array<i64: 2, 1024>}, {transform_indices = @transform_1, window_bounds = array<i64: 2, 1024>}]} {
    %c0 = arith.constant 0 : index
    %c0_0 = arith.constant 0 : index
    %0 = vector.load %arg1[%c0, %c0_0] : memref<2x1024xf32, #tpu.memory_space<vmem>>, vector<2x1024xf32>
    %cst = arith.constant -1.000000e+00 : f32
    %1 = vector.broadcast %cst : f32 to vector<2x1024xf32>
    %2 = arith.maximumf %0, %1 : vector<2x1024xf32>
    %cst_1 = arith.constant 1.000000e+00 : f32
    %3 = vector.broadcast %cst_1 : f32 to vector<2x1024xf32>
    %4 = arith.minimumf %2, %3 : vector<2x1024xf32>
    %c0_2 = arith.constant 0 : index
    %c0_3 = arith.constant 0 : index
    %5 = vector.load %arg2[%c0_2, %c0_3] : memref<2x1024xf32, #tpu.memory_space<vmem>>, vector<2x1024xf32>
    tpu.vector_store %arg2[%c0_2, %c0_3], %4 {strides = array<i32>} : memref<2x1024xf32, #tpu.memory_space<vmem>>, vector<2x1024xf32>,
    return
  }
  func.func @transform_0(%arg0: i32) -> (i32, i32) {
    %c0_i32 = arith.constant 0 : i32
    %c0_i32_0 = arith.constant 0 : i32
    return %arg0, %c0_i32 : i32, i32
  }
  func.func @transform_1(%arg0: i32) -> (i32, i32) {
    %c0_i32 = arith.constant 0 : i32
    %c0_i32_0 = arith.constant 0 : i32
    return %arg0, %c0_i32 : i32, i32
  }
}

</mosaic_0001>

<bundles_post_ra>
// kernel: pallas_clip.1
= control target key start
LH: loop header
LB: loop body
LE: loop exit
PB: predicated region body
PF: predicated region fallthrough
CT: control target
= control target key end

     0   :  { %s44_s0 = inlined_call_operand.vmem [shape: f32[2,1024], index: 0, kind: input, shape index: {}]   ;;  %s45_s1 = inlined_call_operand.vmem [shape: f32[2,1024], index: 1, kind: output, shape index: {}]  }
   0x1   :  { %v8_v0 = vld [vmem:[%s44_s0] sm:$0xff]  ;;  %v9_v1 = vld [vmem:[%s44_s0 + $0x8] sm:$0xff] }
   0x2   :  { %v20_v2 = vclamps-f32 %v8_v0, 1.0  ;;  %v21_v3 = vclamps-f32 %v9_v1, 1.0 }
   0x4   :  { %14 = vst [vmem:[%s45_s1] sm:$0xff] %v20_v2  ;;  %15 = vst [vmem:[%s45_s1 + $0x8] sm:$0xff] %v21_v3 }

</bundles_post_ra>
